<compile_context>
chip_gen: v6e
topology: v6e:2x2x1
jax: 0.10.0
libtpu: 0.0.40
codegen_flags: <defaults>
</compile_context>

<pallas_src>
import functools

import jax
import jax.numpy as jnp
import numpy as np
from jax.experimental import pallas as pl
from jax.experimental.pallas import tpu as pltpu


_MIB = 1024 * 1024
_VMEM_TILE_BUDGET = 40 * _MIB      # double-buffered working-set target (v7x-safe)
_VMEM_LIMIT_CAP = 48 * _MIB        # never ask the compiler for more than this
_RESIDENT_W_BYTES = 8 * _MIB       # weight(+bias)-resident-in-VMEM threshold


def _round_up(x: int, m: int) -> int:
    return ((x + m - 1) // m) * m


def _cdiv(a: int, b: int) -> int:
    return -(-a // b)


def _pick_tile_128(dim128: int, cap: int) -> int:
    """dim128 is a multiple of 128.  Pick a tile (multiple of 128, <= cap) that
    minimises the total padded extent cdiv(dim128, tile) * tile; ties -> largest."""
    if dim128 <= cap:
        return dim128
    best_t, best_pad = 128, None
    for t in range(128, cap + 1, 128):
        padded = _cdiv(dim128, t) * t
        if best_pad is None or padded < best_pad or (padded == best_pad and t > best_t):
            best_t, best_pad = t, padded
    return best_t


def _pick_tm(m: int, row_budget: int, cap: int = 1024) -> int:
    """Rows per M tile: a multiple of 8 (or the full m) and always <= m."""
    cap = max(8, min(cap, row_budget))
    if m <= cap:
        if m >= 512:                            # give both v7x TensorCores a block
            half = _round_up(_cdiv(m, 2), 8)
            if half <= m:
                return half
        return m                                # single full-extent block (always legal)
    return max(8, (cap // 8) * 8)


def _vmem_limit(est_bytes: int) -> int:
    # Default scoped VMEM is only 16 MiB (v5e) / 32 MiB (v6e+); raise it for the
    # larger tiles but stay <= 48 MiB so the config is also safe on v7x (64 MiB/TC).
    return int(min(_VMEM_LIMIT_CAP, max(2 * est_bytes, 16 * _MIB)))


# ---------------------------------------------------------------------------
# Kernels
# ---------------------------------------------------------------------------

def _dense_resident_kernel(x_ref, w_ref, b_ref, o_ref):
    # x_ref: (tm, c_in), w_ref: (c_in, n_pad) resident, b_ref: (1, n_pad),
    # o_ref: (tm, n_pad).  Single MXU contraction, bias add, cast, store.
    acc = jnp.dot(x_ref[...], w_ref[...], preferred_element_type=jnp.float32)
    o_ref[...] = (acc + b_ref[...].astype(jnp.float32)).astype(o_ref.dtype)


def _dense_tiled_kernel(x_ref, w_ref, b_ref, o_ref, *acc_scratch,
                        c_in, tk, ragged_k):
    # x_ref: (tm, tk), w_ref: (tk, tn) [already transposed to (k, n)],
    # b_ref: (1, tn), o_ref: (tm, tn).
    # When o_ref is f32 there is no scratch: we accumulate directly into the
    # K-resident output block (its index map ignores k).
    acc_ref = acc_scratch[0] if acc_scratch else o_ref
    k = pl.program_id(2)

    @pl.when(k == 0)
    def _():
        acc_ref[...] = jnp.zeros_like(acc_ref)

    x = x_ref[...]
    if ragged_k:
        # Explicitly zero columns >= c_in of the ragged last K tile; the VMEM
        # beyond the valid region is undefined (never rely on garbage * 0).
        col = k * tk + jax.lax.broadcasted_iota(jnp.int32, x.shape, 1)
        x = jnp.where(col < c_in, x, jnp.zeros_like(x))

    acc_ref[...] += jnp.dot(x, w_ref[...], preferred_element_type=jnp.float32)

    @pl.when(k == pl.num_programs(2) - 1)
    def _():
        o_ref[...] = (acc_ref[...] + b_ref[...].astype(jnp.float32)).astype(o_ref.dtype)


# ---------------------------------------------------------------------------
# Wrappers
# ---------------------------------------------------------------------------

def _dense_resident(x2d, weight, bias, m, c_in, c_out, n_pad, out_dtype, itemsize):
    k_lanes = _round_up(c_in, 128)
    w_bytes = _round_up(c_in, 8) * n_pad * itemsize
    per_row = 2 * (k_lanes + n_pad) * itemsize            # double-buffered x + out
    row_budget = max(8, (_VMEM_TILE_BUDGET - w_bytes) // per_row)
    tm = _pick_tm(m, row_budget)

    w_t = weight.T                                         # (c_in, c_out), done once
    b_p = bias.reshape(1, c_out)
    if n_pad != c_out:
        w_t = jnp.pad(w_t, ((0, 0), (0, n_pad - c_out)))
        b_p = jnp.pad(b_p, ((0, 0), (0, n_pad - c_out)))

    est = w_bytes + tm * per_row + 8 * n_pad * itemsize
    cost = pl.CostEstimate(
        flops=2 * m * c_in * c_out, transcendentals=0,
        bytes_accessed=(m * c_in + c_in * n_pad + m * n_pad + n_pad) * itemsize)

    out = pl.pallas_call(
        _dense_resident_kernel,
        out_shape=jax.ShapeDtypeStruct((m, n_pad), out_dtype),
        grid_spec=pltpu.PrefetchScalarGridSpec(
            num_scalar_prefetch=0,
            grid=(_cdiv(m, tm),),
            in_specs=[
                pl.BlockSpec((tm, c_in), lambda i: (i, 0)),       # X: streamed over M
                pl.BlockSpec((c_in, n_pad), lambda i: (0, 0)),    # W^T: VMEM-resident
                pl.BlockSpec((1, n_pad), lambda i: (0, 0)),       # bias: VMEM-resident
            ],
            out_specs=pl.BlockSpec((tm, n_pad), lambda i: (i, 0)),
        ),
        compiler_params=pltpu.CompilerParams(
            dimension_semantics=("parallel",),
            vmem_limit_bytes=_vmem_limit(est)),
        cost_estimate=cost,
    )(x2d, w_t, b_p)
    return out, n_pad


def _dense_tiled(x2d, weight, bias, m, c_in, c_out, n_pad128, out_dtype, itemsize):
    k128 = _round_up(c_in, 128)
    tk = _pick_tile_128(k128, cap=1024)
    nk = _cdiv(k128, tk)
    tn = _pick_tile_128(n_pad128, cap=512)
    n_pad = _cdiv(n_pad128, tn) * tn
    tm = _pick_tm(m, row_budget=1 << 30, cap=512)

    if nk == 1:
        # Single K step: full-extent, unpadded K block -> no masking needed.
        k_pad, tk_x, ragged_k = c_in, c_in, False
    else:
        k_pad, tk_x, ragged_k = nk * tk, tk, (nk * tk != c_in)

    w_t = weight.T                                          # (c_in, c_out), done once
    b_p = bias.reshape(1, c_out)
    if (k_pad, n_pad) != (c_in, c_out):
        w_t = jnp.pad(w_t, ((0, k_pad - c_in), (0, n_pad - c_out)))
    if n_pad != c_out:
        b_p = jnp.pad(b_p, ((0, 0), (0, n_pad - c_out)))

    use_scratch = (out_dtype != jnp.float32)   # f32 output: accumulate in o_ref
    scratch = [pltpu.VMEM((tm, tn), jnp.float32)] if use_scratch else []
    kernel = functools.partial(_dense_tiled_kernel,
                               c_in=c_in, tk=tk_x, ragged_k=ragged_k)

    est = 2 * (tm * tk_x + tk_x * tn + tm * tn) * itemsize
    if use_scratch:
        est += tm * tn * 4
    cost = pl.CostEstimate(
        flops=2 * m * c_in * c_out, transcendentals=0,
        bytes_accessed=(m * c_in * (n_pad // tn)
                        + k_pad * n_pad * _cdiv(m, tm)
                        + m * n_pad + n_pad) * itemsize)

    out = pl.pallas_call(
        kernel,
        out_shape=jax.ShapeDtypeStruct((m, n_pad), out_dtype),
        grid_spec=pltpu.PrefetchScalarGridSpec(
            num_scalar_prefetch=0,
            grid=(_cdiv(m, tm), n_pad // tn, nk),
            in_specs=[
                pl.BlockSpec((tm, tk_x), lambda i, j, k: (i, k)),   # X tile
                pl.BlockSpec((tk_x, tn), lambda i, j, k: (k, j)),   # W^T tile
                pl.BlockSpec((1, tn), lambda i, j, k: (0, j)),      # bias (K-invariant)
            ],
            out_specs=pl.BlockSpec((tm, tn), lambda i, j, k: (i, j)),
            scratch_shapes=scratch,
        ),
        compiler_params=pltpu.CompilerParams(
            dimension_semantics=("parallel", "parallel", "arbitrary"),
            vmem_limit_bytes=_vmem_limit(est)),
        cost_estimate=cost,
    )(x2d, w_t, b_p)
    return out, n_pad


def dense_layer(node_feats, weight, bias, *, force_pallas=False,
                resident_weight_bytes=_RESIDENT_W_BYTES):
    """nn.Linear forward: node_feats(..., c_in) @ weight(c_out, c_in)^T + bias(c_out,)."""
    c_out, c_in = weight.shape
    lead = node_feats.shape[:-1]
    m = int(np.prod(lead)) if lead else 1
    out_dtype = node_feats.dtype

    # Tiny problems are launch-overhead bound in Pallas; let fused XLA handle them.
    if not force_pallas and m * c_out < 128 * 128:
        return (node_feats @ weight.T + bias).astype(out_dtype)

    x2d = node_feats.reshape(m, c_in)
    itemsize = jnp.dtype(out_dtype).itemsize
    n_pad128 = _round_up(c_out, 128)

    w_vmem_bytes = _round_up(c_in, 8) * n_pad128 * itemsize
    if 0 < w_vmem_bytes <= resident_weight_bytes:
        out, n_pad = _dense_resident(x2d, weight, bias, m, c_in, c_out,
                                     n_pad128, out_dtype, itemsize)
    else:
        out, n_pad = _dense_tiled(x2d, weight, bias, m, c_in, c_out,
                                  n_pad128, out_dtype, itemsize)

    if n_pad != c_out:
        out = out[:, :c_out]
    return out.reshape(*lead, c_out)


def init_dense_params(key, c_in, c_out, zero_init=False, dtype=jnp.float32):
    """Matches DenseLayer.__init__: uniform(+-sqrt(6/(c_in+c_out))) weight, zero bias."""
    if zero_init:
        weight = jnp.zeros((c_out, c_in), dtype=dtype)
    else:
        bound = float(np.sqrt(6.0 / (c_in + c_out)))
        weight = jax.random.uniform(
            key, (c_out, c_in), minval=-bound, maxval=bound, dtype=dtype)
    bias = jnp.zeros((c_out,), dtype=dtype)
    return weight, bias


if __name__ == "__main__":
    key = jax.random.PRNGKey(0)
    k_x, k_w, k_x2, k_w2, k_b2, k_x3 = jax.random.split(key, 6)

    # 1) Small shape typical of the module's node-feature input
    #    (force_pallas so the resident-weight kernel path itself is exercised).
    batch, nodes, c_in, c_out = 2, 8, 32, 16
    x = jax.random.normal(k_x, (batch, nodes, c_in), dtype=jnp.float32)
    weight, bias = init_dense_params(k_w, c_in, c_out)
    y = dense_layer(x, weight, bias, force_pallas=True)
    jax.block_until_ready(y)
    y_ref = jnp.einsum("bni,oi->bno", x, weight,
                       precision=jax.lax.Precision.HIGHEST) + bias
    np.testing.assert_allclose(np.asarray(y), np.asarray(y_ref), rtol=1e-4, atol=1e-4)

    # 2) Ragged M (13 rows, not a multiple of 8) through the resident-weight path.
    x3 = jax.random.normal(k_x3, (13, c_in), dtype=jnp.float32)
    y3 = dense_layer(x3, weight, bias, force_pallas=True)
    jax.block_until_ready(y3)
    y3_ref = jnp.einsum("ni,oi->no", x3, weight,
                        precision=jax.lax.Precision.HIGHEST) + bias
    np.testing.assert_allclose(np.asarray(y3), np.asarray(y3_ref), rtol=1e-4, atol=1e-4)

    # 3) Ragged c_in / c_out through the (forced) tiled path: exercises K-axis
    #    accumulation directly in the f32 output block, in-kernel masking of the
    #    ragged last K tile (c_in=1100 -> k_pad=1152, tk=384, 3 K steps) and
    #    N padding (c_out=200 -> 256) with a nonzero bias.
    b2, n2, ci2, co2 = 2, 160, 1100, 200
    x2 = jax.random.normal(k_x2, (b2, n2, ci2), dtype=jnp.float32)
    w2, _ = init_dense_params(k_w2, ci2, co2)
    bias2 = 0.1 * jax.random.normal(k_b2, (co2,), dtype=jnp.float32)
    y2 = dense_layer(x2, w2, bias2, force_pallas=True, resident_weight_bytes=0)
    jax.block_until_ready(y2)
    y2_ref = jnp.einsum("bni,oi->bno", x2, w2,
                        precision=jax.lax.Precision.HIGHEST) + bias2
    np.testing.assert_allclose(np.asarray(y2), np.asarray(y2_ref), rtol=2e-3, atol=2e-3)

    print("KERNEL_OK")
</pallas_src>

<mosaic_0001>
module attributes {stable_mosaic.version = 11 : i64} {
  func.func @_dense_resident_kernel(%arg0: i32, %arg1: memref<16x32xf32, #tpu.memory_space<vmem>>, %arg2: memref<32x128xf32, #tpu.memory_space<vmem>>, %arg3: memref<1x128xf32, #tpu.memory_space<vmem>>, %arg4: memref<16x128xf32, #tpu.memory_space<vmem>>) attributes {dimension_semantics = [#tpu.dimension_semantics<parallel>], iteration_bounds = array<i64: 1>, scalar_prefetch = 0 : i64, scratch_operands = 0 : i64, tpu.core_type = #tpu.core_type<tc>, window_params = [{transform_indices = @transform_0, window_bounds = array<i64: 16, 32>}, {pipeline_mode = #tpu.pipeline_mode<synchronous>, transform_indices = @transform_1, window_bounds = array<i64: 32, 128>}, {pipeline_mode = #tpu.pipeline_mode<synchronous>, transform_indices = @transform_2, window_bounds = array<i64: 1, 128>}, {transform_indices = @transform_3, window_bounds = array<i64: 16, 128>}]} {
    %c0 = arith.constant 0 : index
    %c0_0 = arith.constant 0 : index
    %0 = vector.load %arg1[%c0, %c0_0] : memref<16x32xf32, #tpu.memory_space<vmem>>, vector<16x32xf32>
    %c0_1 = arith.constant 0 : index
    %c0_2 = arith.constant 0 : index
    %1 = vector.load %arg2[%c0_1, %c0_2] : memref<32x128xf32, #tpu.memory_space<vmem>>, vector<32x128xf32>
    %cst = arith.constant dense<0.000000e+00> : vector<16x128xf32>
    %2 = tpu.matmul %0, %1, %cst {dimension_numbers = #tpu.dot_dimension_numbers<[1], [0], [0], [1], [0, 0, 1, 1], [], []>} : vector<16x32xf32>, vector<32x128xf32>, vector<16x128xf32> -> vector<16x128xf32>
    %c0_3 = arith.constant 0 : index
    %c0_4 = arith.constant 0 : index
    %3 = vector.load %arg3[%c0_3, %c0_4] : memref<1x128xf32, #tpu.memory_space<vmem>>, vector<1x128xf32>
    %4 = vector.broadcast %3 : vector<1x128xf32> to vector<16x128xf32>
    %5 = arith.addf %2, %4 : vector<16x128xf32>
    %c0_5 = arith.constant 0 : index
    %c0_6 = arith.constant 0 : index
    %6 = vector.load %arg4[%c0_5, %c0_6] : memref<16x128xf32, #tpu.memory_space<vmem>>, vector<16x128xf32>
    tpu.vector_store %arg4[%c0_5, %c0_6], %5 {strides = array<i32>} : memref<16x128xf32, #tpu.memory_space<vmem>>, vector<16x128xf32>,
    return
  }
  func.func @transform_0(%arg0: i32) -> (i32, i32) {
    %c0_i32 = arith.constant 0 : i32
    %c0_i32_0 = arith.constant 0 : i32
    return %arg0, %c0_i32 : i32, i32
  }
  func.func @transform_1(%arg0: i32) -> (i32, i32) {
    %c0_i32 = arith.constant 0 : i32
    %c0_i32_0 = arith.constant 0 : i32
    %c0_i32_1 = arith.constant 0 : i32
    return %c0_i32, %c0_i32_0 : i32, i32
  }
  func.func @transform_2(%arg0: i32) -> (i32, i32) {
    %c0_i32 = arith.constant 0 : i32
    %c0_i32_0 = arith.constant 0 : i32
    %c0_i32_1 = arith.constant 0 : i32
    return %c0_i32, %c0_i32_0 : i32, i32
  }
  func.func @transform_3(%arg0: i32) -> (i32, i32) {
    %c0_i32 = arith.constant 0 : i32
    %c0_i32_0 = arith.constant 0 : i32
    return %arg0, %c0_i32 : i32, i32
  }
}

</mosaic_0001>

<bundles_post_ra>
// kernel: tpu_custom_call.1
= control target key start
LH: loop header
LB: loop body
LE: loop exit
PB: predicated region body
PF: predicated region fallthrough
CT: control target
= control target key end

     0   :  { %8 = vsyncpa [#allocation3], 0  ;;  %s297_s0 = inlined_call_operand.hbm [shape: f32[16,32], index: 0, kind: input, shape index: {}]   ;;  %s298_s1 = inlined_call_operand.hbm [shape: f32[32,128], index: 1, kind: input, shape index: {}]   ;;  %s299_s2 = inlined_call_operand.vmem [shape: f32[1,128], index: 2, kind: input, shape index: {}]   ;;  %s300_s3 = inlined_call_operand.hbm [shape: f32[16,128], index: 3, kind: output, shape index: {}]  }
   0x1   :  { %9 = vsyncpa [#allocation6], 0 }
   0x2   :  { %10 = vsyncpa [#allocation4], 0  ;;  %s249_s12 = smov [#allocation2]  }
   0x3   :  { %s16_s13 = sshll.u32 %s249_s12, 4  ;;  %s17_s13 = int_to_ptr.vmem [resolvable:$true] %s16_s13 }
   0x4   :  { %s191_s14 = scalar_lea.vmem %s17_s13, 256  ;;  %p196_p1 = scmp.lt.s32.totalorder %s17_s13, %s17_s13 }
   0x5   :  { %p192_p0 = scmp.ne.s32.totalorder %s17_s13, %s191_s14  ;;  %p197_p2 = scmp.lt.s32.totalorder %s191_s14, %s191_s14 }
   0x7   :  { %p198_p3 = por %p197_p2, %p196_p1 }
   0x9   :  { %p199_p4 = pnand %p198_p3, %p192_p0 }
   0xb   :  { %202 = shalt.err (!%p199_p4)
}
   0xc   :  { %s250_s15 = smov 128   ;;  %s251_s16 = smov 8  }
   0xd   :  { %22 = dma.hbm_to_vmem [thread:$0]  %s297_s0, 256, %s17_s13, [#allocation3], %s250_s15, %s250_s15, %s251_s16  }
   0xe   :  { %s252_s19 = smov [#allocation5]  }
   0xf   :  { %s28_s20 = sshll.u32 %s252_s19, 4  ;;  %s29_s20 = int_to_ptr.vmem [resolvable:$true] %s28_s20 }
  0x10   :  { %s211_s21 = scalar_lea.vmem %s29_s20, 512  ;;  %p216_p6 = scmp.lt.s32.totalorder %s29_s20, %s29_s20 }
  0x11   :  { %p212_p5 = scmp.ne.s32.totalorder %s29_s20, %s211_s21  ;;  %p217_p7 = scmp.lt.s32.totalorder %s211_s21, %s211_s21 }
  0x13   :  { %p218_p8 = por %p217_p7, %p216_p6 }
  0x15   :  { %p219_p9 = pnand %p218_p8, %p212_p5 }
  0x17   :  { %222 = shalt.err (!%p219_p9)
}
  0x18   :  { %34 = dma.hbm_to_vmem [thread:$0]  %s298_s1, 512, %s29_s20, [#allocation6], %s250_s15, %s250_s15, %s251_s16  }
  0x19   :  { %243 = dma.done.wait [#allocation3], 256  }
  0x1a   :  { %244 = vsyncadd [#allocation3], 4294967040 }
  0x1b   :  { %245 = dma.done.wait [#allocation6], 512  }
  0x1c   :  { %246 = vsyncadd [#allocation6], 4294966784  ;;  %vm56_vm0 = vcmask 261120   ;;  %v48_v0 = vld [vmem:[#allocation5 + $0x18] sm:$0xff]  ;;  %v47_v1 = vld [vmem:[#allocation5 + $0x10] sm:$0xff]  ;;  %s253_s24 = smov [#allocation7]  }
  0x1d   :  { %167 = vmatprep.subr.mxu0 %v48_v0  ;;  %v43_v2 = vld [vmem:[#allocation2] sm:$0xff]  ;;  %v46_v3 = vld [vmem:[#allocation5 + $0x8] sm:$0xff]  ;;  %v45_v4 = vld [vmem:[#allocation5] sm:$0xff]  ;;  %s145_s25 = sshll.u32 %s253_s24, 4  ;;  %s146_s25 = int_to_ptr.vmem [resolvable:$true] %s145_s25 }
  0x1e   :  { %168 = vmatpush3.msra.mxu0 %v48_v0  ;;  %175 = vmatprep.mubr.msk.f32.mxu0 %vm56_vm0, %v43_v2  ;;  %v44_v5 = vld [vmem:[#allocation2 + $0x8] sm:$0xff]  ;;  %v158_v6 = vld [vmem:[%s299_s2] ss:$0 sm:$0xff]  ;;  %s223_s26 = scalar_lea.vmem %s146_s25, 256  ;;  %p228_p11 = scmp.lt.s32.totalorder %s146_s25, %s146_s25 }
  0x1f   :  { %169 = vmatprep.subr.mxu0 %v47_v1  ;;  %p224_p10 = scmp.ne.s32.totalorder %s146_s25, %s223_s26  ;;  %p229_p12 = scmp.lt.s32.totalorder %s223_s26, %s223_s26 }
  0x20   :  { %170 = vmatpush3.msra.mxu0 %v47_v1 }
  0x21   :  { %171 = vmatprep.subr.mxu0 %v46_v3  ;;  %p230_p13 = por %p229_p12, %p228_p11 }
  0x22   :  { %172 = vmatpush3.msra.mxu0 %v46_v3 }
  0x23   :  { %173 = vmatprep.subr.mxu0 %v45_v4  ;;  %p231_p0 = pnand %p230_p13, %p224_p10 }
  0x24   :  { %174 = vmatpush3.msra.mxu0 %v45_v4 }
  0x25   :  { %176 = vmatmul.mubr.msk.f32.vlgmr.msra.gmra.mxu0 %vm56_vm0, %v44_v5 }
  0xe5   :  { %v177_v7 = vpop.f32.mrf.mxu0 }
  0xe6   :  { %v135_v8 = vadd.f32 %v177_v7, %v158_v6 }
  0xe7   :  { %v129_v9 = vpop.f32.mrf.mxu0 }
  0xe8   :  { %139 = vst [vmem:[#allocation7 + $0x8] sm:$0xff] %v135_v8  ;;  %v130_v10 = vadd.f32 %v158_v6, %v129_v9 }
  0xea   :  { %138 = vst [vmem:[#allocation7] sm:$0xff] %v130_v10 }
  0xeb   :  { %234 = shalt.err (!%p231_p0)
}
  0xec   :  { %151 = dma.vmem_to_hbm [thread:$0]  %s146_s25, 256, %s300_s3, [#allocation4], %s250_s15, %s250_s15, %s251_s16  }
  0xed   :  { %247 = dma.done.wait [#allocation4], 256  }
  0xee   :  { %248 = vsyncadd [#allocation4], 4294967040 }
  0xef   :  { %155 = vsyncpa [#allocation3], 1 }
  0xf0   :  { %156 = vsyncpa [#allocation6], 1 }
  0xf1   :  { %157 = vsyncpa [#allocation4], 1 }

</bundles_post_ra>
